<compile_context>
chip_gen: v7x
topology: tpu7x:2x2x1
jax: 0.10.0
libtpu: 0.0.40
codegen_flags: <defaults>
</compile_context>

<pallas_src>
import jax
import jax.numpy as jnp
from jax import lax
from jax.experimental import pallas as pl
from jax.experimental.pallas import tpu as pltpu

BN_EPS = 1e-5
VMEM_LIMIT = 32 * 1024 * 1024
ROW_TILE_PIXELS = 256


def _round_up(x, m):
    return (x + m - 1) // m * m


def _dot_precision(dtype):
    return lax.Precision.HIGHEST if dtype == jnp.float32 else lax.Precision.DEFAULT


# -----------------------------------------------------------------------------
# Pallas kernels
# -----------------------------------------------------------------------------
def _fused_conv_kernel(x_ref, w_ref, b_ref, o_ref):
    # x_ref: (TM, 9*Cin) pre-assembled im2col rows (stride-2 path)
    # w_ref: (9*Cin, Cout) folded RepVGG weight, b_ref: (1, Cout) folded bias
    acc = jnp.dot(x_ref[...], w_ref[...],
                  precision=_dot_precision(x_ref.dtype),
                  preferred_element_type=jnp.float32)
    o_ref[...] = jnp.maximum(acc + b_ref[...], 0.0).astype(o_ref.dtype)


def _make_s1_kernel(wp2, th, cin):
    # stride-1 path: x_ref is a flattened band of (th+3) padded rows of width
    # wp2 = W+2; build the im2col matrix in VMEM, then one fused-K matmul.
    m = th * wp2                                   # virtual output pixels / tile

    def kernel(x_ref, w_ref, b_ref, o_ref, col_ref):
        for k in range(9):                         # 9 static slice copies
            ky, kx = divmod(k, 3)
            col_ref[:, k * cin:(k + 1) * cin] = x_ref[pl.ds(ky * wp2 + kx, m), :]
        acc = jnp.dot(col_ref[...].astype(w_ref.dtype), w_ref[...],
                      precision=_dot_precision(w_ref.dtype),
                      preferred_element_type=jnp.float32)
        o_ref[...] = jnp.maximum(acc + b_ref[...], 0.0).astype(o_ref.dtype)

    return kernel


def _head_kernel(x_ref, w_ref, b_ref, out_ref):
    # x_ref: (N, HW, C) -> global average pool over HW, then linear layer.
    g = jnp.mean(x_ref[...].astype(jnp.float32), axis=1)          # (N, C)
    out_ref[...] = (jnp.dot(g, w_ref[...],
                            precision=lax.Precision.HIGHEST,
                            preferred_element_type=jnp.float32)
                    + b_ref[...]).astype(out_ref.dtype)


# -----------------------------------------------------------------------------
# Exact RepVGG branch fusion (1x1 + identity folded into the 3x3 kernel)
# -----------------------------------------------------------------------------
def fold_block(params, has_identity):
    w3 = params["w3"]                              # (3, 3, cin, cout) HWIO
    cin, cout = params["w1"].shape
    w = w3.at[1, 1].add(params["w1"])              # 1x1 branch -> center tap
    b = params["b3"] + params["b1"]
    if has_identity:                               # identity BN -> diag on center
        w = w.at[1, 1].add(jnp.diag(params["sid"]))
        b = b + params["bid"]
    return w.reshape(9 * cin, cout), b.reshape(1, cout)


# -----------------------------------------------------------------------------
# Block wrappers
# -----------------------------------------------------------------------------
def _block_stride2(x, wf, b):
    """stride-2 RepVGG block: glue im2col (~2.25x input bytes) + tiled matmul."""
    n, h, w, cin = x.shape
    cout = wf.shape[-1]
    ho, wo = (h - 1) // 2 + 1, (w - 1) // 2 + 1

    xp = jnp.pad(x, ((0, 0), (1, 1), (1, 1), (0, 0)))
    taps = [xp[:, ky:ky + 2 * (ho - 1) + 1:2, kx:kx + 2 * (wo - 1) + 1:2, :]
            for ky in range(3) for kx in range(3)]
    col = jnp.concatenate(taps, axis=-1).reshape(n * ho * wo, 9 * cin)

    npix = n * ho * wo
    tm = min(ROW_TILE_PIXELS, _round_up(npix, 8))
    npix_pad = _round_up(npix, tm)
    if npix_pad != npix:
        col = jnp.pad(col, ((0, npix_pad - npix), (0, 0)))

    out = pl.pallas_call(
        _fused_conv_kernel,
        out_shape=jax.ShapeDtypeStruct((npix_pad, cout), x.dtype),
        grid=(npix_pad // tm,),
        in_specs=[pl.BlockSpec((tm, 9 * cin), lambda i: (i, 0)),
                  pl.BlockSpec((9 * cin, cout), lambda i: (0, 0)),
                  pl.BlockSpec((1, cout), lambda i: (0, 0))],
        out_specs=pl.BlockSpec((tm, cout), lambda i: (i, 0)),
        compiler_params=pltpu.CompilerParams(
            dimension_semantics=("parallel",),
            vmem_limit_bytes=VMEM_LIMIT),
    )(col, wf, b)
    return out[:npix].reshape(n, ho, wo, cout)


def _block_stride1(x, wf, b, out_dtype):
    """stride-1 RepVGG block: haloed row bands (1x bytes) + in-kernel im2col."""
    n, h, w, cin = x.shape
    cout = wf.shape[-1]
    wp2 = w + 2

    th = max(1, min(h, ROW_TILE_PIXELS // wp2))    # output rows per tile
    if th >= 4:
        th -= th % 4
    r = -(-h // th)
    h_pad = r * th

    xb = x.astype(jnp.float32)                     # see TODO(synk) above
    # pad so each band has th+3 full padded rows available (flat-index guard)
    xp = jnp.pad(xb, ((0, 0), (1, h_pad - h + 2), (1, 1), (0, 0)))
    bands = jnp.stack([xp[:, i * th:i * th + th + 3] for i in range(r)], axis=1)
    band_len = (th + 3) * wp2
    bands = bands.reshape(n * r, band_len, cin)

    m = th * wp2                                   # virtual outputs per tile
    kernel = _make_s1_kernel(wp2, th, cin)
    out = pl.pallas_call(
        kernel,
        out_shape=jax.ShapeDtypeStruct((n * r, m, cout), out_dtype),
        grid=(n * r,),
        in_specs=[pl.BlockSpec((None, band_len, cin), lambda t: (t, 0, 0)),
                  pl.BlockSpec((9 * cin, cout), lambda t: (0, 0)),
                  pl.BlockSpec((1, cout), lambda t: (0, 0))],
        out_specs=pl.BlockSpec((None, m, cout), lambda t: (t, 0, 0)),
        scratch_shapes=[pltpu.VMEM((m, 9 * cin), jnp.float32)],
        compiler_params=pltpu.CompilerParams(
            dimension_semantics=("parallel",),
            vmem_limit_bytes=VMEM_LIMIT),
    )(bands, wf, b)

    out = out.reshape(n, r, th, wp2, cout)[:, :, :, :w, :]
    out = out.reshape(n, h_pad, w, cout)
    return out[:, :h]


def repvgg_head(x_nhwc, w_lin, b_lin):
    n, h, w, c = x_nhwc.shape
    x = x_nhwc.reshape(n, h * w, c)
    num_classes = w_lin.shape[-1]
    return pl.pallas_call(
        _head_kernel,
        out_shape=jax.ShapeDtypeStruct((n, num_classes), jnp.float32),
    )(x, w_lin, b_lin.reshape(1, num_classes))


def repvgg_forward(x_nchw, blocks, w_lin, b_lin, compute_dtype=jnp.float32):
    x = jnp.transpose(x_nchw, (0, 2, 3, 1)).astype(compute_dtype)   # NCHW->NHWC
    for params, stride, has_id in blocks:
        wf, bias = fold_block(params, has_id)      # exact RepVGG re-param fold
        wf = wf.astype(compute_dtype)              # bias stays f32
        if stride == 2:
            x = _block_stride2(x, wf, bias)
        else:
            x = _block_stride1(x, wf, bias, compute_dtype)
    return repvgg_head(x, w_lin, b_lin)


# -----------------------------------------------------------------------------
# Deterministic parameter construction (conv+BN fused, eval-mode BN)
# -----------------------------------------------------------------------------
def init_block_params(key, cin, cout, has_identity):
    ks = jax.random.split(key, 20)

    def conv_bn_fused(i0, kshape, fan_in):
        w = ((2.0 / fan_in) ** 0.5) * jax.random.normal(ks[i0], kshape, jnp.float32)
        bconv = 0.05 * jax.random.normal(ks[i0 + 1], (cout,), jnp.float32)
        gamma = 1.0 + 0.1 * jax.random.normal(ks[i0 + 2], (cout,), jnp.float32)
        beta = 0.05 * jax.random.normal(ks[i0 + 3], (cout,), jnp.float32)
        mean = 0.05 * jax.random.normal(ks[i0 + 4], (cout,), jnp.float32)
        var = 0.5 + jax.random.uniform(ks[i0 + 5], (cout,), jnp.float32)
        t = gamma / jnp.sqrt(var + BN_EPS)
        return w * t, (bconv - mean) * t + beta

    w3f, b3f = conv_bn_fused(0, (3, 3, cin, cout), 9 * cin)   # HWIO layout
    w1f, b1f = conv_bn_fused(6, (cin, cout), cin)
    p = {"w3": w3f, "b3": b3f, "w1": w1f, "b1": b1f}
    if has_identity:
        gamma = 1.0 + 0.1 * jax.random.normal(ks[12], (cin,), jnp.float32)
        beta = 0.05 * jax.random.normal(ks[13], (cin,), jnp.float32)
        mean = 0.05 * jax.random.normal(ks[14], (cin,), jnp.float32)
        var = 0.5 + jax.random.uniform(ks[15], (cin,), jnp.float32)
        t = gamma / jnp.sqrt(var + BN_EPS)
        p["sid"] = t
        p["bid"] = beta - mean * t
    return p


def build_repvgg_params(key, num_blocks=(2, 1, 1, 1), num_classes=10,
                        width_multiplier=(0.25, 0.25, 0.25, 0.25)):
    blocks = []                                    # (params, stride, has_identity)
    in_planes = min(64, int(64 * width_multiplier[0]))
    key, k0 = jax.random.split(key)
    blocks.append((init_block_params(k0, 3, in_planes, False), 2, False))
    cur_in = in_planes
    stage_planes = [int(64 * width_multiplier[0]), int(128 * width_multiplier[1]),
                    int(256 * width_multiplier[2]), int(512 * width_multiplier[3])]
    for planes, nb in zip(stage_planes, num_blocks):
        strides = [2] + [1] * (nb - 1)
        for s in strides:
            has_id = (planes == cur_in and s == 1)
            key, kb = jax.random.split(key)
            blocks.append((init_block_params(kb, cur_in, planes, has_id), s, has_id))
            cur_in = planes
    key, kw = jax.random.split(key)
    w_lin = (1.0 / cur_in ** 0.5) * jax.random.normal(kw, (cur_in, num_classes),
                                                      jnp.float32)
    key, kb2 = jax.random.split(key)
    b_lin = 0.05 * jax.random.normal(kb2, (num_classes,), jnp.float32)
    return blocks, w_lin, b_lin


# -----------------------------------------------------------------------------
# Pure-JAX reference (independent 3-branch conv implementation)
# -----------------------------------------------------------------------------
def _block_ref(x, p, stride, has_id):
    cin, cout = p["w1"].shape
    y = lax.conv_general_dilated(x, p["w3"], (stride, stride), ((1, 1), (1, 1)),
                                 dimension_numbers=("NHWC", "HWIO", "NHWC"),
                                 precision=lax.Precision.HIGHEST) + p["b3"]
    y = y + lax.conv_general_dilated(x, p["w1"].reshape(1, 1, cin, cout),
                                     (stride, stride), ((0, 0), (0, 0)),
                                     dimension_numbers=("NHWC", "HWIO", "NHWC"),
                                     precision=lax.Precision.HIGHEST) + p["b1"]
    if has_id:
        y = y + x * p["sid"] + p["bid"]
    return jnp.maximum(y, 0.0)


def repvgg_forward_ref(x_nchw, blocks, w_lin, b_lin):
    x = jnp.transpose(x_nchw, (0, 2, 3, 1))
    for params, stride, has_id in blocks:
        x = _block_ref(x, params, stride, has_id)
    g = jnp.mean(x, axis=(1, 2))
    return jnp.dot(g, w_lin, precision=lax.Precision.HIGHEST) + b_lin


# -----------------------------------------------------------------------------
if __name__ == "__main__":
    key = jax.random.PRNGKey(0)
    kx, kp = jax.random.split(key)
    x = jax.random.normal(kx, (2, 3, 64, 64), jnp.float32)       # NCHW, like PyTorch
    blocks, w_lin, b_lin = build_repvgg_params(kp)

    ref = repvgg_forward_ref(x, blocks, w_lin, b_lin)
    ref_scale = jnp.max(jnp.abs(ref)) + 1e-6

    # f32 path: exact algebraic rewrite of the 3-branch block -> tight check.
    out = repvgg_forward(x, blocks, w_lin, b_lin)
    out = jax.block_until_ready(out)
    assert out.shape == (2, 10)
    rel_err = float(jnp.max(jnp.abs(out - ref)) / ref_scale)
    assert rel_err < 1e-3, f"f32 mismatch vs reference: rel_err={rel_err}"

    # bf16 operand path (recommended on v6e/v7x): looser, justified tolerance.
    out_bf16 = repvgg_forward(x, blocks, w_lin, b_lin, compute_dtype=jnp.bfloat16)
    out_bf16 = jax.block_until_ready(out_bf16)
    rel_err_bf16 = float(jnp.max(jnp.abs(out_bf16.astype(jnp.float32) - ref))
                         / ref_scale)
    assert rel_err_bf16 < 0.1, f"bf16 mismatch vs reference: rel_err={rel_err_bf16}"

    print("KERNEL_OK")
</pallas_src>

<mosaic_0001>
module attributes {stable_mosaic.version = 11 : i64} {
  func.func @_fused_conv_kernel(%arg0: i32, %arg1: memref<256x27xf32, #tpu.memory_space<vmem>>, %arg2: memref<27x16xf32, #tpu.memory_space<vmem>>, %arg3: memref<1x16xf32, #tpu.memory_space<vmem>>, %arg4: memref<256x16xf32, #tpu.memory_space<vmem>>) attributes {dimension_semantics = [#tpu.dimension_semantics<parallel>], iteration_bounds = array<i64: 8>, scalar_prefetch = 0 : i64, scratch_operands = 0 : i64, tpu.core_type = #tpu.core_type<tc>, window_params = [{transform_indices = @transform_0, window_bounds = array<i64: 256, 27>}, {pipeline_mode = #tpu.pipeline_mode<synchronous>, transform_indices = @transform_1, window_bounds = array<i64: 27, 16>}, {pipeline_mode = #tpu.pipeline_mode<synchronous>, transform_indices = @transform_2, window_bounds = array<i64: 1, 16>}, {transform_indices = @transform_3, window_bounds = array<i64: 256, 16>}]} {
    %c0 = arith.constant 0 : index
    %c0_0 = arith.constant 0 : index
    %0 = vector.load %arg1[%c0, %c0_0] : memref<256x27xf32, #tpu.memory_space<vmem>>, vector<256x27xf32>
    %c0_1 = arith.constant 0 : index
    %c0_2 = arith.constant 0 : index
    %1 = vector.load %arg2[%c0_1, %c0_2] : memref<27x16xf32, #tpu.memory_space<vmem>>, vector<27x16xf32>
    %cst = arith.constant dense<0.000000e+00> : vector<256x16xf32>
    %2 = tpu.matmul %0, %1, %cst {dimension_numbers = #tpu.dot_dimension_numbers<[1], [0], [0], [1], [0, 0, 1, 1], [], []>, precision = #tpu.contract_precision<fp32>} : vector<256x27xf32>, vector<27x16xf32>, vector<256x16xf32> -> vector<256x16xf32>
    %c0_3 = arith.constant 0 : index
    %c0_4 = arith.constant 0 : index
    %3 = vector.load %arg3[%c0_3, %c0_4] : memref<1x16xf32, #tpu.memory_space<vmem>>, vector<1x16xf32>
    %4 = vector.broadcast %3 : vector<1x16xf32> to vector<256x16xf32>
    %5 = arith.addf %2, %4 : vector<256x16xf32>
    %cst_5 = arith.constant 0.000000e+00 : f32
    %6 = vector.broadcast %cst_5 : f32 to vector<256x16xf32>
    %7 = arith.maximumf %5, %6 : vector<256x16xf32>
    %c0_6 = arith.constant 0 : index
    %c0_7 = arith.constant 0 : index
    %8 = vector.load %arg4[%c0_6, %c0_7] : memref<256x16xf32, #tpu.memory_space<vmem>>, vector<256x16xf32>
    tpu.vector_store %arg4[%c0_6, %c0_7], %7 {strides = array<i32>} : memref<256x16xf32, #tpu.memory_space<vmem>>, vector<256x16xf32>,
    return
  }
  func.func @transform_0(%arg0: i32) -> (i32, i32) {
    %c0_i32 = arith.constant 0 : i32
    %c0_i32_0 = arith.constant 0 : i32
    return %arg0, %c0_i32 : i32, i32
  }
  func.func @transform_1(%arg0: i32) -> (i32, i32) {
    %c0_i32 = arith.constant 0 : i32
    %c0_i32_0 = arith.constant 0 : i32
    %c0_i32_1 = arith.constant 0 : i32
    return %c0_i32, %c0_i32_0 : i32, i32
  }
  func.func @transform_2(%arg0: i32) -> (i32, i32) {
    %c0_i32 = arith.constant 0 : i32
    %c0_i32_0 = arith.constant 0 : i32
    %c0_i32_1 = arith.constant 0 : i32
    return %c0_i32, %c0_i32_0 : i32, i32
  }
  func.func @transform_3(%arg0: i32) -> (i32, i32) {
    %c0_i32 = arith.constant 0 : i32
    %c0_i32_0 = arith.constant 0 : i32
    return %arg0, %c0_i32 : i32, i32
  }
}

</mosaic_0001>

<bundles_post_ra>
// kernel: tpu_custom_call.1
= control target key start
LH: loop header
LB: loop body
LE: loop exit
PB: predicated region body
PF: predicated region fallthrough
CT: control target
= control target key end

     0   :  { %s3097_s12 = smov 0   ;;  %s3702_s0 = inlined_call_operand.vmem [shape: f32[2048,27], index: 0, kind: input, shape index: {}]   ;;  %s3703_s1 = inlined_call_operand.vmem [shape: f32[27,16], index: 1, kind: input, shape index: {}]   ;;  %s3704_s2 = inlined_call_operand.vmem [shape: f32[1,16], index: 2, kind: input, shape index: {}]   ;;  %s3705_s3 = inlined_call_operand.vmem [shape: f32[2048,16], index: 3, kind: output, shape index: {}]  }
   0x1 LB: > { %s2257_s13 = sadd.s32 4294967295, %s3075_s12   ;;  %p2261_p0 = scmp.ge.s32.totalorder %s3075_s12, 1  ;;  %s3075_s12 = sphi %s3097_s12, %s13_s12  }
   0x2   : > { %p138_p1 = scmp.lt.s32.totalorder %s3075_s12, 9 }
   0x4   : > { %p139_p2 = pnand %p2261_p0, %p138_p1 }
   0x6   : > { %142 = sbr.rel (%p139_p2) target bundleno = 440 (0x1b8), region = 32 }
   0xd   : > { %v206_v0 = vld [vmem:[%s3703_s1] sm:$0xff]  ;;  %v207_v1 = vld [vmem:[%s3703_s1 + $0x8] sm:$0xff]  ;;  %v208_v2 = vld [vmem:[%s3703_s1 + $0x10] sm:$0xff]  ;;  %vm314_vm0 = vcmask 1042432   ;;  %s2262_s20 = sshll.u32 %s2257_s13, 5  ;;  %vm217_vm1 = vcmask 220160  }
   0xe   : > { %v319_v3 = vand.u32 4294901760, %v206_v0  ;;  %v322_v4 = vand.u32 4294901760, %v207_v1  ;;  %v209_v5 = vld [vmem:[%s3703_s1 + $0x18] sm:$0x7]  ;;  %v325_v6 = vand.u32 4294901760, %v208_v2  ;;  %p163_p3 = scmp.lt.s32.totalorder %s2262_s20, 255 }
   0xf   : > { %v316_v7 = vsel %vm314_vm0, %v209_v5, 0  ;;  %vm2168_vm2 = vcmask 130048  }
  0x10   : > { %v3117_v8 = vpack.c.bf16 %v322_v4, %v319_v3  ;;  %v328_v9 = vand.u32 4294901760, %v316_v7  ;;  %s3774_s20 = smov (!%p163_p3, %s2262_s20), 255  ;;  %v3121_v10 = vsub.f32 %v206_v0, %v319_v3  ;;  %v3123_v11 = vsub.f32 %v207_v1, %v322_v4 }
  0x11   : > { %v3125_v12 = vsub.f32 %v208_v2, %v325_v6  ;;  %s2263_s23 = sshll.u32 %s3774_s20, 3 }
  0x12   : > { %2846 = vmatprep.subr.bf16.mxu0 %v3117_v8  ;;  %2822 = vmatprep.subr.bf16.mxu1 %v3117_v8  ;;  %v3129_v13 = vpack.c.bf16 %v328_v9, %v325_v6  ;;  %v710_v14 = vand.u32 4294901760, %v3121_v10  ;;  %v717_v15 = vand.u32 4294901760, %v3123_v11  ;;  %s3141_s26 = scalar_lea.vmem %s3702_s0, %s2263_s23  ;;  %v3157_v29 = vsub.f32 %v316_v7, %v328_v9  ;;  %s3603_s4 = scalar_lea.vmem %s3705_s3, %s2263_s23 }
  0x13   : > { %2848 = vmatpush3.bf16.msra.mxu0 %v3117_v8  ;;  %2824 = vmatpush3.bf16.msra.mxu1 %v3117_v8  ;;  %v174_v16 = vld [vmem:[%s3141_s26] sm:$0xff]  ;;  %v175_v17 = vld [vmem:[%s3141_s26 + $0x8] sm:$0xff]  ;;  %v176_v20 = vld [vmem:[%s3141_s26 + $0x10] sm:$0xff]  ;;  %v3707_v22 = vand.u32 4294901760, %v3125_v12 }
  0x14   : > { %2850 = vmatprep.subr.bf16.mxu0 %v3129_v13  ;;  %2826 = vmatprep.subr.bf16.mxu1 %v3129_v13  ;;  %v711_v18 = vsub.f32 %v3121_v10, %v710_v14  ;;  %v718_v19 = vsub.f32 %v3123_v11, %v717_v15  ;;  %v2853_v21 = vpack.c.bf16 %v717_v15, %v710_v14  ;;  %v219_v23 = vsel %vm217_vm1, %v174_v16, 0  ;;  %v177_v26 = vld [vmem:[%s3141_s26 + $0x18] sm:$0xff]  ;;  %v178_v27 = vld [vmem:[%s3141_s26 + $0x20] sm:$0xff]  ;;  %v179_v28 = vld [vmem:[%s3141_s26 + $0x28] sm:$0xff] }
  0x15   : > { %v222_v24 = vsel %vm217_vm1, %v175_v17, 0  ;;  %v225_v25 = vsel %vm217_vm1, %v176_v20, 0  ;;  %v3159_v30 = vand.u32 4294901760, %v219_v23  ;;  %v180_v34 = vld [vmem:[%s3141_s26 + $0x30] sm:$0xff]  ;;  %v228_v36 = vsel %vm217_vm1, %v177_v26, 0  ;;  %v181_v43 = vld [vmem:[%s3141_s26 + $0x38] sm:$0xff] }
  0x16   : > { %v3161_v31 = vand.u32 4294901760, %v222_v24  ;;  %v712_v32 = vand.u32 4294901760, %v711_v18  ;;  %v719_v33 = vand.u32 4294901760, %v718_v19  ;;  %v3166_v35 = vand.u32 4294901760, %v225_v25  ;;  %v182_v0 = vld [vmem:[%s3141_s26 + $0x40] sm:$0xff]  ;;  %v183_v1 = vld [vmem:[%s3141_s26 + $0x48] sm:$0xff] }
  0x17   : > { %2852 = vmatpush3.bf16.msra.mxu0 %v3129_v13  ;;  %2828 = vmatpush3.bf16.msra.mxu1 %v3129_v13  ;;  %v231_v37 = vsel %vm217_vm1, %v178_v27, 0  ;;  %v234_v38 = vsel %vm217_vm1, %v179_v28, 0  ;;  %v3172_v39 = vsub.f32 %v219_v23, %v3159_v30  ;;  %v3177_v42 = vand.u32 4294901760, %v228_v36  ;;  %v184_v15 = vld [vmem:[%s3141_s26 + $0x50] sm:$0xff]  ;;  %v185_v16 = vld [vmem:[%s3141_s26 + $0x58] sm:$0xff]  ;;  %v186_v20 = vld [vmem:[%s3141_s26 + $0x60] sm:$0xff] }
  0x18   : > { %v3175_v40 = vsub.f32 %v222_v24, %v3161_v31  ;;  %v2829_v41 = vpack.c.bf16 %v719_v33, %v712_v32  ;;  %2854 = vmatprep.subr.bf16.mxu0 %v2853_v21  ;;  %v3181_v44 = vsub.f32 %v225_v25, %v3166_v35  ;;  %v3183_v45 = vand.u32 4294901760, %v231_v37  ;;  %v187_v27 = vld [vmem:[%s3141_s26 + $0x68] sm:$0xff]  ;;  %v188_v28 = vld [vmem:[%s3141_s26 + $0x70] sm:$0xff] }
  0x19   : > { %v3185_v46 = vand.u32 4294901760, %v234_v38  ;;  %v237_v47 = vsel %vm217_vm1, %v180_v34, 0  ;;  %v389_v48 = vand.u32 4294901760, %v3172_v39  ;;  %v3191_v50 = vsub.f32 %v228_v36, %v3177_v42 }
  0x1a   : > { %v399_v49 = vand.u32 4294901760, %v3175_v40  ;;  %2830 = vmatprep.subr.bf16.mxu1 %v2829_v41  ;;  %v3193_v51 = vand.u32 4294901760, %v237_v47  ;;  %v409_v52 = vand.u32 4294901760, %v3181_v44  ;;  %v3197_v53 = vsub.f32 %v231_v37, %v3183_v45 }
  0x1b   : > { %v3200_v54 = vsub.f32 %v234_v38, %v3185_v46  ;;  %v240_v55 = vsel %vm217_vm1, %v181_v43, 0  ;;  %2661 = vmatprep.mubr.f32.mxu0 %v389_v48  ;;  %v390_v56 = vsub.f32 %v3172_v39, %v389_v48  ;;  %v419_v58 = vand.u32 4294901760, %v3191_v50 }
  0x1c   : > { %3729 = vst [vmem:[#allocation2_spill] sm:$0xff] %v3197_v53  ;;  %v400_v57 = vsub.f32 %v3175_v40, %v399_v49  ;;  %v3207_v59 = vsub.f32 %v237_v47, %v3193_v51  ;;  %2662 = vmatmul.mubr.f32.vlgmr.msra.gmra.mrb[0].mxu0 %v399_v49  ;;  %v410_v60 = vsub.f32 %v3181_v44, %v409_v52  ;;  %v429_v61 = vand.u32 4294901760, %v3197_v53 }
  0x1d   : > { %3730 = vst [vmem:[#allocation3_spill] sm:$0xff] %v3200_v54  ;;  %v439_v62 = vand.u32 4294901760, %v3200_v54  ;;  %v3212_v63 = vand.u32 4294901760, %v240_v55  ;;  %v391_v2 = vand.u32 4294901760, %v390_v56  ;;  %2664 = vmatprep.mubr.f32.mxu0 %v409_v52  ;;  %2856 = vmatpush3.bf16.msra.mxu0 %v2853_v21  ;;  %v420_v4 = vsub.f32 %v3191_v50, %v419_v58 }
  0x1e   : > { %3731 = vst [vmem:[#allocation4_spill] sm:$0xff] %v3207_v59  ;;  %v401_v3 = vand.u32 4294901760, %v400_v57  ;;  %v449_v5 = vand.u32 4294901760, %v3207_v59  ;;  %v411_v6 = vand.u32 4294901760, %v410_v60  ;;  %v430_v7 = vsub.f32 %v3197_v53, %v429_v61 }
  0x1f   : > { %v440_v9 = vsub.f32 %v3200_v54, %v439_v62  ;;  %v3221_v14 = vsub.f32 %v240_v55, %v3212_v63  ;;  %2493 = vmatprep.mubr.f32.mxu1 %v391_v2  ;;  %v243_v18 = vsel %vm217_vm1, %v182_v0, 0  ;;  %v246_v19 = vsel %vm217_vm1, %v183_v1, 0  ;;  %v189_v55 = vld [vmem:[%s3141_s26 + $0x78] sm:$0xff]  ;;  %v204_v54 = vld [vmem:[%s3141_s26 + $0xf0] sm:$0xff] }
  0x20   : > { %v450_v17 = vsub.f32 %v3207_v59, %v449_v5  ;;  %v3706_v21 = vand.u32 4294901760, %v3157_v29  ;;  %2494 = vmatmul.mubr.f32.vlgmr.msra.gmra.mrb[0].mxu1 %v401_v3  ;;  %2665 = vmatmul.mubr.f32.gmra.mrb[2].mxu0 %v419_v58  ;;  %v421_v23 = vand.u32 4294901760, %v420_v4  ;;  %v431_v24 = vand.u32 4294901760, %v430_v7 }
  0x21   : > { %3732 = vst [vmem:[#allocation5_spill] sm:$0xff] %v3221_v14  ;;  %v459_v25 = vand.u32 4294901760, %v3221_v14  ;;  %v3231_v26 = vand.u32 4294901760, %v243_v18  ;;  %2832 = vmatpush3.bf16.msra.mxu1 %v2829_v41  ;;  %2496 = vmatprep.mubr.f32.mxu1 %v411_v6  ;;  %v441_v32 = vand.u32 4294901760, %v440_v9  ;;  %v3235_v33 = vand.u32 4294901760, %v246_v19 }
  0x22   : > { %v249_v34 = vsel %vm217_vm1, %v184_v15, 0  ;;  %v252_v36 = vsel %vm217_vm1, %v185_v16, 0  ;;  %2667 = vmatprep.mubr.f32.mxu0 %v429_v61  ;;  %v451_v37 = vand.u32 4294901760, %v450_v17  ;;  %v255_v41 = vsel %vm217_vm1, %v186_v20, 0  ;;  %v190_v16 = vld [vmem:[%s3141_s26 + $0x80] sm:$0xff] }
  0x23   : > { %v3240_v38 = vsub.f32 %v243_v18, %v3231_v26  ;;  %v3242_v43 = vand.u32 4294901760, %v249_v34  ;;  %v3244_v47 = vand.u32 4294901760, %v252_v36  ;;  %v3247_v48 = vsub.f32 %v246_v19, %v3235_v33 }
  0x24   : > { %v258_v49 = vsel %vm217_vm1, %v187_v27, 0  ;;  %v261_v52 = vsel %vm217_vm1, %v188_v28, 0  ;;  %2497 = vmatmul.mubr.f32.gmra.mrb[2].mxu1 %v421_v23  ;;  %2668 = vmatmul.mubr.f32.gmra.mrb[4].mxu0 %v439_v62  ;;  %v460_v57 = vsub.f32 %v3221_v14, %v459_v25  ;;  %v3262_v0 = vand.u32 4294901760, %v255_v41  ;;  %v191_v28 = vld [vmem:[%s3141_s26 + $0x88] sm:$0xff] }
  0x25   : > { %3733 = vst [vmem:[#allocation6_spill] sm:$0xff] %v3240_v38  ;;  %3734 = vst [vmem:[#allocation7_spill] sm:$0xff] %v3247_v48  ;;  %v469_v56 = vand.u32 4294901760, %v3240_v38  ;;  %v3256_v58 = vsub.f32 %v249_v34, %v3242_v43  ;;  %v3259_v60 = vsub.f32 %v252_v36, %v3244_v47  ;;  %2499 = vmatprep.mubr.f32.mxu1 %v431_v24  ;;  %2670 = vmatprep.mubr.f32.mxu0 %v449_v5 }
  0x26   : > { %v479_v61 = vand.u32 4294901760, %v3247_v48  ;;  %v3264_v1 = vand.u32 4294901760, %v258_v49  ;;  %v3266_v62 = vand.u32 4294901760, %v261_v52  ;;  %v264_v6 = vsel %vm217_vm1, %v189_v55, 0 }
  0x27   : > { %3735 = vst [vmem:[#allocation8_spill] sm:$0xff] %v3256_v58  ;;  %3736 = vst [vmem:[#allocation9_spill] sm:$0xff] %v3259_v60  ;;  %v470_v2 = vsub.f32 %v3240_v38, %v469_v56  ;;  %v489_v3 = vand.u32 4294901760, %v3256_v58  ;;  %v499_v4 = vand.u32 4294901760, %v3259_v60  ;;  %v3274_v5 = vsub.f32 %v255_v41, %v3262_v0 }
  0x28   : > { %v480_v7 = vsub.f32 %v3247_v48, %v479_v61  ;;  %v3277_v9 = vsub.f32 %v258_v49, %v3264_v1  ;;  %v3280_v15 = vsub.f32 %v261_v52, %v3266_v62  ;;  %2500 = vmatmul.mubr.f32.gmra.mrb[4].mxu1 %v441_v32  ;;  %2671 = vmatmul.mubr.f32.gmra.mrb[6].mxu0 %v459_v25  ;;  %v461_v17 = vand.u32 4294901760, %v460_v57 }
  0x29   : > { %3737 = vst [vmem:[#allocation10_spill] sm:$0xff] %v3274_v5  ;;  %v490_v18 = vsub.f32 %v3256_v58, %v489_v3  ;;  %v3284_v19 = vand.u32 4294901760, %v264_v6  ;;  %v725_v20 = vsub.f32 %v3125_v12, %v3707_v22  ;;  %2502 = vmatprep.mubr.f32.mxu1 %v451_v37  ;;  %2673 = vmatprep.mubr.f32.mxu0 %v469_v56  ;;  %v471_v23 = vand.u32 4294901760, %v470_v2  ;;  %v192_v37 = vld [vmem:[%s3141_s26 + $0x90] sm:$0xff]  ;;  %v193_v2 = vld [vmem:[%s3141_s26 + $0x98] sm:$0xff]  ;;  %v195_v22 = vld [vmem:[%s3141_s26 + $0xa8] sm:$0xff] }
  0x2a   : > { %3738 = vst [vmem:[#allocation11_spill] sm:$0xff] %v3277_v9  ;;  %3739 = vst [vmem:[#allocation12_spill] sm:$0xff] %v3280_v15  ;;  %v509_v24 = vand.u32 4294901760, %v3274_v5  ;;  %v500_v27 = vsub.f32 %v3259_v60, %v499_v4  ;;  %v519_v25 = vand.u32 4294901760, %v3277_v9  ;;  %v529_v32 = vand.u32 4294901760, %v3280_v15  ;;  %v196_v58 = vld [vmem:[%s3141_s26 + $0xb0] sm:$0xff] }
  0x2b   : > { %v267_v34 = vsel %vm217_vm1, %v190_v16, 0  ;;  %v481_v36 = vand.u32 4294901760, %v480_v7  ;;  %v3296_v41 = vsub.f32 %v264_v6, %v3284_v19  ;;  %v491_v52 = vand.u32 4294901760, %v490_v18 }
  0x2c   : > { %v3298_v49 = vand.u32 4294901760, %v267_v34  ;;  %2503 = vmatmul.mubr.f32.gmra.mrb[6].mxu1 %v461_v17  ;;  %2674 = vmatmul.mubr.f32.gmra.mrb[8].mxu0 %v479_v61  ;;  %v270_v55 = vsel %vm217_vm1, %v191_v28, 0  ;;  %v726_v56 = vand.u32 4294901760, %v725_v20  ;;  %v732_v57 = vsub.f32 %v3157_v29, %v3706_v21  ;;  %v194_v21 = vld [vmem:[%s3141_s26 + $0xa0] sm:$0xff] }
  0x2d   : > { %3740 = vst [vmem:[#allocation13_spill] sm:$0xff] %v3296_v41  ;;  %2505 = vmatprep.mubr.f32.mxu1 %v471_v23  ;;  %2676 = vmatprep.mubr.f32.mxu0 %v489_v3  ;;  %v501_v6 = vand.u32 4294901760, %v500_v27  ;;  %v510_v7 = vsub.f32 %v3274_v5, %v509_v24  ;;  %v520_v16 = vsub.f32 %v3277_v9, %v519_v25  ;;  %v3312_v18 = vand.u32 4294901760, %v270_v55 }
  0x2e   : > { %v3309_v61 = vsub.f32 %v267_v34, %v3298_v49  ;;  %v530_v17 = vsub.f32 %v3280_v15, %v529_v32  ;;  %v733_v20 = vand.u32 4294901760, %v732_v57  ;;  %v273_v28 = vsel %vm217_vm1, %v192_v37, 0 }
  0x2f   : > { %v539_v3 = vand.u32 4294901760, %v3296_v41  ;;  %v3318_v23 = vand.u32 4294901760, %v273_v28  ;;  %v276_v27 = vsel %vm217_vm1, %v193_v2, 0  ;;  %v3742_v34 = vand.u32 4294901760, %v3125_v12 }
  0x30   : > { %3741 = vst [vmem:[#allocation14_spill] sm:$0xff] %v3309_v61  ;;  %v3743_v9 = vand.u32 4294901760, %v3157_v29  ;;  %2506 = vmatmul.mubr.f32.gmra.mrb[8].mxu1 %v481_v36  ;;  %2677 = vmatmul.mubr.f32.gmra.mrb[10].mxu0 %v499_v4  ;;  %v549_v57 = vand.u32 4294901760, %v3309_v61  ;;  %v3327_v37 = vsub.f32 %v270_v55, %v3312_v18  ;;  %v2833_v5 = vpack.c.bf16 %v733_v20, %v726_v56  ;;  %v197_v36 = vld [vmem:[%s3141_s26 + $0xb8] sm:$0xff]  ;;  %v198_v56 = vld [vmem:[%s3141_s26 + $0xc0] sm:$0xff] }
  0x31   : > { %v3329_v60 = vand.u32 4294901760, %v276_v27  ;;  %2508 = vmatprep.mubr.f32.mxu1 %v491_v52  ;;  %2679 = vmatprep.mubr.f32.mxu0 %v509_v24  ;;  %v511_v2 = vand.u32 4294901760, %v510_v7  ;;  %v3333_v48 = vsub.f32 %v273_v28, %v3318_v23  ;;  %v282_v4 = vsel %vm217_vm1, %v195_v22, 0 }
  0x32   : > { %v2857_v15 = vpack.c.bf16 %v3743_v9, %v3742_v34  ;;  %3744 = vst [vmem:[#allocation15_spill] sm:$0xff] %v3327_v37  ;;  %v279_v9 = vsel %vm217_vm1, %v194_v21, 0  ;;  %v521_v34 = vand.u32 4294901760, %v520_v16  ;;  %2834 = vmatprep.subr.bf16.mxu1 %v2833_v5  ;;  %v3343_v20 = vpack.c.bf16 %v3123_v11, %v3121_v10 }
  0x33   : > { %3745 = vst [vmem:[#allocation16_spill] sm:$0xff] %v3333_v48  ;;  %v3338_v55 = vand.u32 4294901760, %v279_v9  ;;  %v531_v24 = vand.u32 4294901760, %v530_v17  ;;  %v540_v52 = vsub.f32 %v3296_v41, %v539_v3  ;;  %2836 = vmatpush3.bf16.msra.mxu1 %v2833_v5  ;;  %v3346_v21 = vand.u32 4294901760, %v282_v4 }
  0x34   : > { %2858 = vmatprep.subr.bf16.mxu0 %v2857_v15  ;;  %v285_v22 = vsel %vm217_vm1, %v196_v58, 0  ;;  %2509 = vmatmul.mubr.f32.gmra.mrb[10].mxu1 %v501_v6  ;;  %v559_v7 = vand.u32 4294901760, %v3327_v37  ;;  %v550_v16 = vsub.f32 %v3309_v61, %v549_v57  ;;  %v3352_v10 = vsub.f32 %v276_v27, %v3329_v60  ;;  %v199_v6 = vld [vmem:[%s3141_s26 + $0xc8] sm:$0xff]  ;;  %v200_v27 = vld [vmem:[%s3141_s26 + $0xd0] sm:$0xff] }
  0x35   : > { %2860 = vmatpush3.bf16.msra.mxu0 %v2857_v15  ;;  %v288_v11 = vsel %vm217_vm1, %v197_v36, 0  ;;  %2511 = vmatprep.mubr.f32.mxu1 %v511_v2  ;;  %v569_v5 = vand.u32 4294901760, %v3333_v48  ;;  %v3357_v15 = vsub.f32 %v279_v9, %v3338_v55  ;;  %v3359_v58 = vand.u32 4294901760, %v285_v22 }
  0x36   : > { %2680 = vmatmul.mubr.f32.gmra.mrb[12].mxu0 %v519_v25  ;;  %3746 = vst [vmem:[#allocation17_spill] sm:$0xff] %v3352_v10  ;;  %v291_v25 = vsel %vm217_vm1, %v198_v56, 0  ;;  %2838 = vmatprep.subr.bf16.mxu1 %v3343_v20  ;;  %v3366_v17 = vsub.f32 %v282_v4, %v3346_v21  ;;  %v541_v2 = vand.u32 4294901760, %v540_v52  ;;  %v560_v9 = vsub.f32 %v3327_v37, %v559_v7 }
  0x37   : > { %2682 = vmatprep.mubr.f32.mxu0 %v529_v32  ;;  %3747 = vst [vmem:[#allocation18_spill] sm:$0xff] %v3357_v15  ;;  %2862 = vmatprep.subr.bf16.mxu0 %v3117_v8  ;;  %v3369_v28 = vsub.f32 %v285_v22, %v3359_v58  ;;  %v3371_v32 = vand.u32 4294901760, %v288_v11  ;;  %v579_v36 = vand.u32 4294901760, %v3352_v10  ;;  %v3376_v56 = vand.u32 4294901760, %v291_v25 }
  0x38   : > { %3748 = vst [vmem:[#allocation19_spill] sm:$0xff] %v3366_v17  ;;  %2512 = vmatmul.mubr.f32.gmra.mrb[12].mxu1 %v521_v34  ;;  %v551_v4 = vand.u32 4294901760, %v550_v16  ;;  %v570_v22 = vsub.f32 %v3333_v48, %v569_v5  ;;  %v589_v61 = vand.u32 4294901760, %v3357_v15  ;;  %v294_v41 = vsel %vm217_vm1, %v199_v6, 0 }
  0x39   : > { %3749 = vst [vmem:[#allocation20_spill] sm:$0xff] %v3369_v28  ;;  %2514 = vmatprep.mubr.f32.mxu1 %v531_v24  ;;  %v297_v34 = vsel %vm217_vm1, %v200_v27, 0  ;;  %v599_v52 = vand.u32 4294901760, %v3366_v17  ;;  %v609_v37 = vand.u32 4294901760, %v3369_v28  ;;  %v3386_v38 = vsub.f32 %v288_v11, %v3371_v32  ;;  %v202_v24 = vld [vmem:[%s3141_s26 + $0xe0] sm:$0xff] }
  0x3a   : > { %2683 = vmatmul.mubr.f32.gmra.mrb[14].mxu0 %v539_v3  ;;  %v201_v3 = vld [vmem:[%s3141_s26 + $0xd8] sm:$0xff]  ;;  %v580_v16 = vsub.f32 %v3352_v10, %v579_v36  ;;  %v3391_v6 = vsub.f32 %v291_v25, %v3376_v56  ;;  %v3393_v27 = vand.u32 4294901760, %v294_v41  ;;  %v571_v48 = vand.u32 4294901760, %v570_v22 }
  0x3b   : > { %2685 = vmatprep.mubr.f32.mxu0 %v549_v57  ;;  %3750 = vst [vmem:[#allocation21_spill] sm:$0xff] %v3386_v38  ;;  %v561_v57 = vand.u32 4294901760, %v560_v9  ;;  %v590_v14 = vsub.f32 %v3357_v15, %v589_v61  ;;  %v3396_v59 = vand.u32 4294901760, %v297_v34  ;;  %v300_v11 = vsel %vm217_vm1, %v201_v3, 0 }
  0x3c   : > { %2515 = vmatmul.mubr.f32.gmra.mrb[14].mxu1 %v541_v2  ;;  %3751 = vst [vmem:[#allocation22_spill] sm:$0xff] %v3391_v6  ;;  %v203_v2 = vld [vmem:[%s3141_s26 + $0xe8] sm:$0xff]  ;;  %v600_v9 = vsub.f32 %v3366_v17, %v599_v52  ;;  %v619_v10 = vand.u32 4294901760, %v3386_v38  ;;  %v610_v25 = vsub.f32 %v3369_v28, %v609_v37  ;;  %v3407_v22 = vsub.f32 %v294_v41, %v3393_v27 }
  0x3d   : > { %2517 = vmatprep.mubr.f32.mxu1 %v551_v4  ;;  %v629_v4 = vand.u32 4294901760, %v3391_v6  ;;  %v3409_v3 = vand.u32 4294901760, %v300_v11  ;;  %v3412_v17 = vsub.f32 %v297_v34, %v3396_v59  ;;  %v306_v28 = vsel %vm217_vm1, %v203_v2, 0 }
  0x3e   : > { %2686 = vmatmul.mubr.f32.gmra.mrb[16].mxu0 %v559_v7  ;;  %v303_v7 = vsel %vm217_vm1, %v202_v24, 0  ;;  %v591_v24 = vand.u32 4294901760, %v590_v14  ;;  %v611_v53 = vand.u32 4294901760, %v610_v25  ;;  %v620_v41 = vsub.f32 %v3386_v38, %v619_v10 }
  0x3f   : > { %2688 = vmatprep.mubr.f32.mxu0 %v569_v5  ;;  %v581_v5 = vand.u32 4294901760, %v580_v16  ;;  %v3414_v15 = vand.u32 4294901760, %v303_v7  ;;  %v601_v16 = vand.u32 4294901760, %v600_v9  ;;  %v630_v14 = vsub.f32 %v3391_v6, %v629_v4 }
  0x40   : > { %2518 = vmatmul.mubr.f32.gmra.mrb[16].mxu1 %v561_v57  ;;  %v205_v57 = vld [vmem:[%s3141_s26 + $0xf8] sm:$0xff]  ;;  %v3425_v34 = vand.u32 4294901760, %v306_v28  ;;  %v621_v25 = vand.u32 4294901760, %v620_v41 }
  0x41   : > { %2520 = vmatprep.mubr.f32.mxu1 %v571_v48  ;;  %v639_v48 = vand.u32 4294901760, %v3407_v22  ;;  %v3429_v2 = vsub.f32 %v303_v7, %v3414_v15  ;;  %v631_v7 = vand.u32 4294901760, %v630_v14 }
  0x42   : > { %2689 = vmatmul.mubr.f32.gmra.mrb[18].mxu0 %v579_v36  ;;  %v309_v36 = vsel %vm217_vm1, %v204_v54, 0  ;;  %v649_v54 = vand.u32 4294901760, %v3412_v17  ;;  %v3437_v6 = vsub.f32 %v306_v28, %v3425_v34 }
  0x43   : > { %2691 = vmatprep.mubr.f32.mxu0 %v589_v61  ;;  %v3423_v61 = vsub.f32 %v300_v11, %v3409_v3  ;;  %v3431_v9 = vand.u32 4294901760, %v309_v36  ;;  %v669_v38 = vand.u32 4294901760, %v3429_v2 }
  0x44   : > { %2521 = vmatmul.mubr.f32.gmra.mrb[18].mxu1 %v581_v5  ;;  %v640_v5 = vsub.f32 %v3407_v22, %v639_v48  ;;  %v679_v28 = vand.u32 4294901760, %v3437_v6 }
  0x45   : > { %2523 = vmatprep.mubr.f32.mxu1 %v591_v24  ;;  %v659_v11 = vand.u32 4294901760, %v3423_v61  ;;  %v650_v24 = vsub.f32 %v3412_v17, %v649_v54 }
  0x46   : > { %2692 = vmatmul.mubr.f32.gmra.mrb[20].mxu0 %v599_v52  ;;  %v312_v52 = vsel %vm217_vm1, %v205_v57, 0  ;;  %v3444_v57 = vsub.f32 %v309_v36, %v3431_v9 }
  0x47   : > { %2694 = vmatprep.mubr.f32.mxu0 %v609_v37  ;;  %v3439_v37 = vand.u32 4294901760, %v312_v52 }
  0x48   : > { %2524 = vmatmul.mubr.f32.gmra.mrb[20].mxu1 %v601_v16  ;;  %v660_v16 = vsub.f32 %v3423_v61, %v659_v11  ;;  %v689_v14 = vand.u32 4294901760, %v3444_v57 }
  0x49   : > { %2526 = vmatprep.mubr.f32.mxu1 %v611_v53  ;;  %v3449_v41 = vsub.f32 %v312_v52, %v3439_v37  ;;  %v651_v53 = vand.u32 4294901760, %v650_v24 }
  0x4a   : > { %2695 = vmatmul.mubr.f32.gmra.mrb[22].mxu0 %v619_v10  ;;  %v641_v10 = vand.u32 4294901760, %v640_v5  ;;  %v661_v36 = vand.u32 4294901760, %v660_v16  ;;  %v690_v52 = vsub.f32 %v3444_v57, %v689_v14 }
  0x4b   : > { %2697 = vmatprep.mubr.f32.mxu0 %v629_v4  ;;  %v670_v4 = vsub.f32 %v3429_v2, %v669_v38 }
  0x4c   : > { %2527 = vmatmul.mubr.f32.gmra.mrb[22].mxu1 %v621_v25  ;;  %v699_v25 = vand.u32 4294901760, %v3449_v41  ;;  %v691_v24 = vand.u32 4294901760, %v690_v52 }
  0x4d   : > { %2529 = vmatprep.mubr.f32.mxu1 %v631_v7  ;;  %v671_v5 = vand.u32 4294901760, %v670_v4 }
  0x4e   : > { %2698 = vmatmul.mubr.f32.gmra.mrb[24].mxu0 %v639_v48  ;;  %v680_v48 = vsub.f32 %v3437_v6, %v679_v28  ;;  %v700_v7 = vsub.f32 %v3449_v41, %v699_v25 }
  0x4f   : > { %2700 = vmatprep.mubr.f32.mxu0 %v649_v54 }
  0x50   : > { %2530 = vmatmul.mubr.f32.gmra.mrb[24].mxu1 %v641_v10  ;;  %v681_v54 = vand.u32 4294901760, %v680_v48 }
  0x51   : > { %2532 = vmatprep.mubr.f32.mxu1 %v651_v53 }
  0x52   : > { %2701 = vmatmul.mubr.f32.gmra.mrb[26].mxu0 %v659_v11  ;;  %v701_v11 = vand.u32 4294901760, %v700_v7 }
  0x53   : > { %2703 = vmatprep.mubr.f32.mxu0 %v669_v38  ;;  %v2841_v38 = vpack.c.bf16 %v3157_v29, %v3125_v12  ;;  %v3753_v12 = vld [vmem:[#allocation3_spill] sm:$0xff]  ;;  %v3755_v29 = vld [vmem:[#allocation5_spill] sm:$0xff] }
  0x54   : > { %2533 = vmatmul.mubr.f32.gmra.mrb[26].mxu1 %v661_v36 }
  0x55   : > { %2535 = vmatprep.mubr.f32.mxu1 %v671_v5 }
  0x56   : > { %2704 = vmatmul.mubr.f32.gmra.mrb[28].mxu0 %v679_v28 }
  0x57   : > { %2706 = vmatprep.mubr.f32.mxu0 %v689_v14 }
  0x58   : > { %2536 = vmatmul.mubr.f32.gmra.mrb[28].mxu1 %v681_v54 }
  0x59   : > { %2538 = vmatprep.mubr.f32.mxu1 %v691_v24 }
  0x5a   : > { %2707 = vmatmul.mubr.f32.gmra.mrb[30].mxu0 %v699_v25 }
  0x5b   : > { %2717 = vmatprep.mubr.f32.mxu0 %v3159_v30 }
  0x5c   : > { %2539 = vmatmul.mubr.f32.gmra.mrb[30].mxu1 %v701_v11 }
  0x5d   : > { %2549 = vmatprep.mubr.f32.mxu1 %v3159_v30 }
  0x5e   : > { %2718 = vmatmul.mubr.f32.vlgmr.msra.gmra.mrb[0].mxu0 %v3161_v31 }
  0x5f   : > { %2720 = vmatprep.mubr.f32.mxu0 %v3166_v35  ;;  %2864 = vmatpush3.bf16.msra.mxu0 %v3117_v8  ;;  %v3752_v8 = vld [vmem:[#allocation2_spill] sm:$0xff] }
  0x60   : > { %2866 = vmatprep.subr.bf16.mxu0 %v3129_v13  ;;  %2550 = vmatmul.mubr.f32.vlgmr.msra.gmra.mrb[0].mxu1 %v3161_v31 }
  0x61   : > { %2840 = vmatpush3.bf16.msra.mxu1 %v3343_v20  ;;  %2552 = vmatprep.mubr.f32.mxu1 %v3166_v35 }
  0x62   : > { %2721 = vmatmul.mubr.f32.gmra.mrb[2].mxu0 %v3177_v42  ;;  %2842 = vmatprep.subr.bf16.mxu1 %v2841_v38 }
  0x63   : > { %2723 = vmatprep.mubr.f32.mxu0 %v3183_v45  ;;  %2868 = vmatpush3.bf16.msra.mxu0 %v3129_v13  ;;  %v3754_v13 = vld [vmem:[#allocation4_spill] sm:$0xff] }
  0x64   : > { %2553 = vmatmul.mubr.f32.gmra.mrb[2].mxu1 %v3177_v42 }
  0x65   : > { %2555 = vmatprep.mubr.f32.mxu1 %v3183_v45  ;;  %2844 = vmatpush3.bf16.msra.mxu1 %v2841_v38 }
  0x66   : > { %2724 = vmatmul.mubr.f32.gmra.mrb[4].mxu0 %v3185_v46 }
  0x67   : > { %2726 = vmatprep.mubr.f32.mxu0 %v3193_v51 }
  0x68   : > { %2556 = vmatmul.mubr.f32.gmra.mrb[4].mxu1 %v3185_v46 }
  0x69   : > { %2558 = vmatprep.mubr.f32.mxu1 %v3193_v51 }
  0x6a   : > { %2727 = vmatmul.mubr.f32.gmra.mrb[6].mxu0 %v3212_v63 }
  0x6b   : > { %2729 = vmatprep.mubr.f32.mxu0 %v3231_v26 }
  0x6c   : > { %2559 = vmatmul.mubr.f32.gmra.mrb[6].mxu1 %v3212_v63 }
  0x6d   : > { %2561 = vmatprep.mubr.f32.mxu1 %v3231_v26 }
  0x6e   : > { %2730 = vmatmul.mubr.f32.gmra.mrb[8].mxu0 %v3235_v33 }
  0x6f   : > { %2732 = vmatprep.mubr.f32.mxu0 %v3242_v43 }
  0x70   : > { %2562 = vmatmul.mubr.f32.gmra.mrb[8].mxu1 %v3235_v33 }
  0x71   : > { %2564 = vmatprep.mubr.f32.mxu1 %v3242_v43 }
  0x72   : > { %2733 = vmatmul.mubr.f32.gmra.mrb[10].mxu0 %v3244_v47 }
  0x73   : > { %2735 = vmatprep.mubr.f32.mxu0 %v3262_v0 }
  0x74   : > { %2565 = vmatmul.mubr.f32.gmra.mrb[10].mxu1 %v3244_v47 }
  0x75   : > { %2567 = vmatprep.mubr.f32.mxu1 %v3262_v0 }
  0x76   : > { %2736 = vmatmul.mubr.f32.gmra.mrb[12].mxu0 %v3264_v1 }
  0x77   : > { %2738 = vmatprep.mubr.f32.mxu0 %v3266_v62 }
  0x78   : > { %2568 = vmatmul.mubr.f32.gmra.mrb[12].mxu1 %v3264_v1 }
  0x79   : > { %2570 = vmatprep.mubr.f32.mxu1 %v3266_v62 }
  0x7a   : > { %2739 = vmatmul.mubr.f32.gmra.mrb[14].mxu0 %v3284_v19 }
  0x7b   : > { %2741 = vmatprep.mubr.f32.mxu0 %v3298_v49 }
  0x7c   : > { %2571 = vmatmul.mubr.f32.gmra.mrb[14].mxu1 %v3284_v19 }
  0x7d   : > { %2573 = vmatprep.mubr.f32.mxu1 %v3298_v49 }
  0x7e   : > { %2742 = vmatmul.mubr.f32.gmra.mrb[16].mxu0 %v3312_v18 }
  0x7f   : > { %2744 = vmatprep.mubr.f32.mxu0 %v3318_v23 }
  0x80   : > { %2574 = vmatmul.mubr.f32.gmra.mrb[16].mxu1 %v3312_v18 }
  0x81   : > { %2576 = vmatprep.mubr.f32.mxu1 %v3318_v23 }
  0x82   : > { %2745 = vmatmul.mubr.f32.gmra.mrb[18].mxu0 %v3329_v60 }
  0x83   : > { %2747 = vmatprep.mubr.f32.mxu0 %v3338_v55 }
  0x84   : > { %2577 = vmatmul.mubr.f32.gmra.mrb[18].mxu1 %v3329_v60 }
  0x85   : > { %2579 = vmatprep.mubr.f32.mxu1 %v3338_v55 }
  0x86   : > { %2748 = vmatmul.mubr.f32.gmra.mrb[20].mxu0 %v3346_v21 }
  0x87   : > { %2750 = vmatprep.mubr.f32.mxu0 %v3359_v58 }
  0x88   : > { %2580 = vmatmul.mubr.f32.gmra.mrb[20].mxu1 %v3346_v21 }
  0x89   : > { %2582 = vmatprep.mubr.f32.mxu1 %v3359_v58 }
  0x8a   : > { %2751 = vmatmul.mubr.f32.gmra.mrb[22].mxu0 %v3371_v32 }
  0x8b   : > { %2753 = vmatprep.mubr.f32.mxu0 %v3376_v56 }
  0x8c   : > { %2583 = vmatmul.mubr.f32.gmra.mrb[22].mxu1 %v3371_v32 }
  0x8d   : > { %2585 = vmatprep.mubr.f32.mxu1 %v3376_v56 }
  0x8e   : > { %2754 = vmatmul.mubr.f32.gmra.mrb[24].mxu0 %v3393_v27 }
  0x8f   : > { %2756 = vmatprep.mubr.f32.mxu0 %v3396_v59 }
  0x90   : > { %2586 = vmatmul.mubr.f32.gmra.mrb[24].mxu1 %v3393_v27 }
  0x91   : > { %2588 = vmatprep.mubr.f32.mxu1 %v3396_v59 }
  0x92   : > { %2757 = vmatmul.mubr.f32.gmra.mrb[26].mxu0 %v3409_v3 }
  0x93   : > { %2759 = vmatprep.mubr.f32.mxu0 %v3414_v15 }
  0x94   : > { %2589 = vmatmul.mubr.f32.gmra.mrb[26].mxu1 %v3409_v3 }
  0x95   : > { %2591 = vmatprep.mubr.f32.mxu1 %v3414_v15 }
  0x96   : > { %2760 = vmatmul.mubr.f32.gmra.mrb[28].mxu0 %v3425_v34 }
  0x97   : > { %2762 = vmatprep.mubr.f32.mxu0 %v3431_v9 }
  0x98   : > { %2592 = vmatmul.mubr.f32.gmra.mrb[28].mxu1 %v3425_v34 }
  0x99   : > { %2594 = vmatprep.mubr.f32.mxu1 %v3431_v9 }
  0x9a   : > { %2763 = vmatmul.mubr.f32.gmra.mrb[30].mxu0 %v3439_v37 }
  0x9b   : > { %2773 = vmatprep.mubr.f32.mxu0 %v3159_v30  ;;  %v3756_v30 = vld [vmem:[#allocation6_spill] sm:$0xff] }
  0x9c   : > { %2595 = vmatmul.mubr.f32.gmra.mrb[30].mxu1 %v3439_v37 }
  0x9d   : > { %2605 = vmatprep.mubr.f32.mxu1 %v3172_v39  ;;  %v3759_v39 = vld [vmem:[#allocation9_spill] sm:$0xff] }
  0x9e   : > { %2774 = vmatmul.mubr.f32.vlgmr.msra.gmra.mrb[0].mxu0 %v3161_v31  ;;  %v3757_v31 = vld [vmem:[#allocation7_spill] sm:$0xff] }
  0x9f   : > { %2776 = vmatprep.mubr.f32.mxu0 %v3166_v35  ;;  %v3758_v35 = vld [vmem:[#allocation8_spill] sm:$0xff] }
  0xa0   : > { %2606 = vmatmul.mubr.f32.vlgmr.msra.gmra.mrb[0].mxu1 %v3175_v40  ;;  %v3760_v40 = vld [vmem:[#allocation10_spill] sm:$0xff] }
  0xa1   : > { %2608 = vmatprep.mubr.f32.mxu1 %v3181_v44  ;;  %v3762_v44 = vld [vmem:[#allocation12_spill] sm:$0xff] }
  0xa2   : > { %2777 = vmatmul.mubr.f32.gmra.mrb[2].mxu0 %v3177_v42  ;;  %v3761_v42 = vld [vmem:[#allocation11_spill] sm:$0xff] }
  0xa3   : > { %2779 = vmatprep.mubr.f32.mxu0 %v3183_v45  ;;  %v3763_v45 = vld [vmem:[#allocation13_spill] sm:$0xff] }
  0xa4   : > { %2609 = vmatmul.mubr.f32.gmra.mrb[2].mxu1 %v3191_v50  ;;  %v3765_v50 = vld [vmem:[#allocation15_spill] sm:$0xff] }
  0xa5   : > { %2611 = vmatprep.mubr.f32.mxu1 %v3752_v8 }
  0xa6   : > { %2780 = vmatmul.mubr.f32.gmra.mrb[4].mxu0 %v3185_v46  ;;  %v3764_v46 = vld [vmem:[#allocation14_spill] sm:$0xff] }
  0xa7   : > { %2782 = vmatprep.mubr.f32.mxu0 %v3193_v51  ;;  %v3766_v51 = vld [vmem:[#allocation16_spill] sm:$0xff] }
  0xa8   : > { %2612 = vmatmul.mubr.f32.gmra.mrb[4].mxu1 %v3753_v12 }
  0xa9   : > { %2614 = vmatprep.mubr.f32.mxu1 %v3754_v13 }
  0xaa   : > { %2783 = vmatmul.mubr.f32.gmra.mrb[6].mxu0 %v3212_v63  ;;  %v3767_v63 = vld [vmem:[#allocation17_spill] sm:$0xff] }
  0xab   : > { %2785 = vmatprep.mubr.f32.mxu0 %v3231_v26  ;;  %v3768_v26 = vld [vmem:[#allocation18_spill] sm:$0xff] }
  0xac   : > { %2615 = vmatmul.mubr.f32.gmra.mrb[6].mxu1 %v3755_v29 }
  0xad   : > { %2617 = vmatprep.mubr.f32.mxu1 %v3756_v30 }
  0xae   : > { %2786 = vmatmul.mubr.f32.gmra.mrb[8].mxu0 %v3235_v33  ;;  %v3769_v33 = vld [vmem:[#allocation19_spill] sm:$0xff] }
  0xaf   : > { %2788 = vmatprep.mubr.f32.mxu0 %v3242_v43  ;;  %v3770_v43 = vld [vmem:[#allocation20_spill] sm:$0xff] }
  0xb0   : > { %2618 = vmatmul.mubr.f32.gmra.mrb[8].mxu1 %v3757_v31 }
  0xb1   : > { %2620 = vmatprep.mubr.f32.mxu1 %v3758_v35 }
  0xb2   : > { %2789 = vmatmul.mubr.f32.gmra.mrb[10].mxu0 %v3244_v47  ;;  %v3771_v47 = vld [vmem:[#allocation21_spill] sm:$0xff] }
  0xb3   : > { %2791 = vmatprep.mubr.f32.mxu0 %v3262_v0 }
  0xb4   : > { %2621 = vmatmul.mubr.f32.gmra.mrb[10].mxu1 %v3759_v39 }
  0xb5   : > { %2623 = vmatprep.mubr.f32.mxu1 %v3760_v40 }
  0xb6   : > { %2792 = vmatmul.mubr.f32.gmra.mrb[12].mxu0 %v3264_v1  ;;  %v3594_v1 = vld [vmem:[%s3704_s2] ss:$0 sm:$0xff] }
  0xb7   : > { %2794 = vmatprep.mubr.f32.mxu0 %v3266_v62 }
  0xb8   : > { %2624 = vmatmul.mubr.f32.gmra.mrb[12].mxu1 %v3761_v42 }
  0xb9   : > { %2626 = vmatprep.mubr.f32.mxu1 %v3762_v44 }
  0xba   : > { %2795 = vmatmul.mubr.f32.gmra.mrb[14].mxu0 %v3284_v19 }
  0xbb   : > { %2797 = vmatprep.mubr.f32.mxu0 %v3298_v49 }
  0xbc   : > { %2627 = vmatmul.mubr.f32.gmra.mrb[14].mxu1 %v3763_v45 }
  0xbd   : > { %2629 = vmatprep.mubr.f32.mxu1 %v3764_v46 }
  0xbe   : > { %2798 = vmatmul.mubr.f32.gmra.mrb[16].mxu0 %v3312_v18 }
  0xbf   : > { %2800 = vmatprep.mubr.f32.mxu0 %v3318_v23 }
  0xc0   : > { %2630 = vmatmul.mubr.f32.gmra.mrb[16].mxu1 %v3765_v50 }
  0xc1   : > { %2632 = vmatprep.mubr.f32.mxu1 %v3766_v51 }
  0xc2   : > { %2801 = vmatmul.mubr.f32.gmra.mrb[18].mxu0 %v3329_v60  ;;  %v3772_v60 = vld [vmem:[#allocation22_spill] sm:$0xff] }
  0xc3   : > { %2803 = vmatprep.mubr.f32.mxu0 %v3338_v55 }
  0xc4   : > { %2633 = vmatmul.mubr.f32.gmra.mrb[18].mxu1 %v3767_v63 }
  0xc5   : > { %2635 = vmatprep.mubr.f32.mxu1 %v3768_v26 }
  0xc6   : > { %2804 = vmatmul.mubr.f32.gmra.mrb[20].mxu0 %v3346_v21 }
  0xc7   : > { %2806 = vmatprep.mubr.f32.mxu0 %v3359_v58 }
  0xc8   : > { %2636 = vmatmul.mubr.f32.gmra.mrb[20].mxu1 %v3769_v33 }
  0xc9   : > { %2638 = vmatprep.mubr.f32.mxu1 %v3770_v43 }
  0xca   : > { %2807 = vmatmul.mubr.f32.gmra.mrb[22].mxu0 %v3371_v32 }
  0xcb   : > { %2809 = vmatprep.mubr.f32.mxu0 %v3376_v56 }
  0xcc   : > { %2639 = vmatmul.mubr.f32.gmra.mrb[22].mxu1 %v3771_v47 }
  0xcd   : > { %2641 = vmatprep.mubr.f32.mxu1 %v3772_v60 }
  0xce   : > { %2810 = vmatmul.mubr.f32.gmra.mrb[24].mxu0 %v3393_v27 }
  0xcf   : > { %2812 = vmatprep.mubr.f32.mxu0 %v3396_v59 }
  0xd0   : > { %2642 = vmatmul.mubr.f32.gmra.mrb[24].mxu1 %v3407_v22 }
  0xd1   : > { %2644 = vmatprep.mubr.f32.mxu1 %v3412_v17 }
  0xd2   : > { %2813 = vmatmul.mubr.f32.gmra.mrb[26].mxu0 %v3409_v3 }
  0xd3   : > { %2815 = vmatprep.mubr.f32.mxu0 %v3414_v15 }
  0xd4   : > { %2645 = vmatmul.mubr.f32.gmra.mrb[26].mxu1 %v3423_v61 }
  0xd5   : > { %2647 = vmatprep.mubr.f32.mxu1 %v3429_v2 }
  0xd6   : > { %2816 = vmatmul.mubr.f32.gmra.mrb[28].mxu0 %v3425_v34 }
  0xd7   : > { %2818 = vmatprep.mubr.f32.mxu0 %v3431_v9 }
  0xd8   : > { %2648 = vmatmul.mubr.f32.gmra.mrb[28].mxu1 %v3437_v6 }
  0xd9   : > { %2650 = vmatprep.mubr.f32.mxu1 %v3444_v57 }
  0xda   : > { %2819 = vmatmul.mubr.f32.gmra.mrb[30].mxu0 %v3439_v37 }
  0xdc   : > { %2651 = vmatmul.mubr.f32.gmra.mrb[30].mxu1 %v3449_v41 }
 0x171   : > { %v2775_v59 = vpop.f32.mrb[0].mxu0 }
 0x172   : > { %v1946_v0 = vpop.f32.mrb[1].mxu0 }
 0x173   : > { %v2607_v62 = vpop.f32.mrb[0].mxu1 }
 0x174   : > { %v2869_v49 = vadd.f32 %v2607_v62, %v3594_v1  ;;  %v1060_v18 = vpop.f32.mrb[1].mxu1 }
 0x175   : > { %v2778_v19 = vpop.f32.mrb[2].mxu0  ;;  %v2871_v55 = vadd.f32 %v3594_v1, %v1060_v18 }
 0x176   : > { %v1958_v23 = vpop.f32.mrb[3].mxu0  ;;  %v2870_v20 = vadd.f32 %v2869_v49, %v2775_v59 }
 0x177   : > { %v2872_v21 = vadd.f32 %v2871_v55, %v1946_v0  ;;  %v2610_v15 = vpop.f32.mrb[2].mxu1 }
 0x178   : > { %v2137_v17 = vmax.f32 %v2870_v20, 0.0  ;;  %v2873_v32 = vadd.f32 %v2610_v15, %v3594_v1  ;;  %v1074_v56 = vpop.f32.mrb[3].mxu1 }
 0x179   : > { %v2781_v58 = vpop.f32.mrb[4].mxu0  ;;  %v2136_v27 = vmax.f32 %v2872_v21, 0.0  ;;  %v2875_v22 = vadd.f32 %v3594_v1, %v1074_v56 }
 0x17a   : > { %v1970_v6 = vpop.f32.mrb[5].mxu0  ;;  %2170 = vst.msk [vmem:[%s3603_s4 + $0x8] sm:$0xff] %vm2168_vm2, %v2137_v17  ;;  %v2874_v3 = vadd.f32 %v2873_v32, %v2778_v19 }
 0x17b   : > { %2169 = vst.msk [vmem:[%s3603_s4] sm:$0xff] %vm2168_vm2, %v2136_v27  ;;  %v2876_v61 = vadd.f32 %v2875_v22, %v1958_v23  ;;  %v2613_v34 = vpop.f32.mrb[4].mxu1 }
 0x17c   : > { %v2139_v9 = vmax.f32 %v2874_v3, 0.0  ;;  %v2877_v37 = vadd.f32 %v2613_v34, %v3594_v1  ;;  %v1088_v57 = vpop.f32.mrb[5].mxu1 }
 0x17d   : > { %v2784_v2 = vpop.f32.mrb[6].mxu0  ;;  %v2138_v16 = vmax.f32 %v2876_v61, 0.0  ;;  %v2879_v28 = vadd.f32 %v3594_v1, %v1088_v57 }
 0x17e   : > { %v1982_v10 = vpop.f32.mrb[7].mxu0  ;;  %2172 = vst.msk [vmem:[%s3603_s4 + $0x18] sm:$0xff] %vm2168_vm2, %v2139_v9  ;;  %v2878_v41 = vadd.f32 %v2877_v37, %v2781_v58 }
 0x17f   : > { %2171 = vst.msk [vmem:[%s3603_s4 + $0x10] sm:$0xff] %vm2168_vm2, %v2138_v16  ;;  %v2880_v53 = vadd.f32 %v2879_v28, %v1970_v6  ;;  %v2616_v4 = vpop.f32.mrb[6].mxu1 }
 0x180   : > { %v2141_v36 = vmax.f32 %v2878_v41, 0.0  ;;  %v2881_v48 = vadd.f32 %v2616_v4, %v3594_v1  ;;  %v1102_v25 = vpop.f32.mrb[7].mxu1 }
 0x181   : > { %v2787_v14 = vpop.f32.mrb[8].mxu0  ;;  %v2140_v52 = vmax.f32 %v2880_v53, 0.0  ;;  %v2883_v54 = vadd.f32 %v3594_v1, %v1102_v25 }
 0x182   : > { %v1994_v5 = vpop.f32.mrb[9].mxu0  ;;  %2174 = vst.msk [vmem:[%s3603_s4 + $0x28] sm:$0xff] %vm2168_vm2, %v2141_v36  ;;  %v2882_v7 = vadd.f32 %v2881_v48, %v2784_v2 }
 0x183   : > { %2173 = vst.msk [vmem:[%s3603_s4 + $0x20] sm:$0xff] %vm2168_vm2, %v2140_v52  ;;  %v2884_v24 = vadd.f32 %v2883_v54, %v1982_v10  ;;  %v2619_v11 = vpop.f32.mrb[8].mxu1 }
 0x184   : > { %v2143_v8 = vmax.f32 %v2882_v7, 0.0  ;;  %v2885_v12 = vadd.f32 %v2619_v11, %v3594_v1  ;;  %v1116_v13 = vpop.f32.mrb[9].mxu1 }
 0x185   : > { %v2790_v38 = vpop.f32.mrb[10].mxu0  ;;  %v2142_v30 = vmax.f32 %v2884_v24, 0.0  ;;  %v2887_v31 = vadd.f32 %v3594_v1, %v1116_v13 }
 0x186   : > { %v2006_v29 = vpop.f32.mrb[11].mxu0  ;;  %2176 = vst.msk [vmem:[%s3603_s4 + $0x38] sm:$0xff] %vm2168_vm2, %v2143_v8  ;;  %v2886_v35 = vadd.f32 %v2885_v12, %v2787_v14 }
 0x187   : > { %2175 = vst.msk [vmem:[%s3603_s4 + $0x30] sm:$0xff] %vm2168_vm2, %v2142_v30  ;;  %v2888_v39 = vadd.f32 %v2887_v31, %v1994_v5  ;;  %v2622_v40 = vpop.f32.mrb[10].mxu1 }
 0x188   : > { %v2145_v44 = vmax.f32 %v2886_v35, 0.0  ;;  %v2889_v45 = vadd.f32 %v2622_v40, %v3594_v1  ;;  %v1130_v46 = vpop.f32.mrb[11].mxu1 }
 0x189   : > { %v2793_v42 = vpop.f32.mrb[12].mxu0  ;;  %v2144_v51 = vmax.f32 %v2888_v39, 0.0  ;;  %v2891_v63 = vadd.f32 %v3594_v1, %v1130_v46 }
 0x18a   : > { %v2018_v50 = vpop.f32.mrb[13].mxu0  ;;  %2178 = vst.msk [vmem:[%s3603_s4 + $0x48] sm:$0xff] %vm2168_vm2, %v2145_v44  ;;  %v2890_v26 = vadd.f32 %v2889_v45, %v2790_v38 }
 0x18b   : > { %2177 = vst.msk [vmem:[%s3603_s4 + $0x40] sm:$0xff] %vm2168_vm2, %v2144_v51  ;;  %v2892_v33 = vadd.f32 %v2891_v63, %v2006_v29  ;;  %v2625_v43 = vpop.f32.mrb[12].mxu1 }
 0x18c   : > { %v2147_v60 = vmax.f32 %v2890_v26, 0.0  ;;  %v2893_v59 = vadd.f32 %v2625_v43, %v3594_v1  ;;  %v1144_v0 = vpop.f32.mrb[13].mxu1 }
 0x18d   : > { %v2796_v47 = vpop.f32.mrb[14].mxu0  ;;  %v2146_v19 = vmax.f32 %v2892_v33, 0.0  ;;  %v2895_v49 = vadd.f32 %v3594_v1, %v1144_v0 }
 0x18e   : > { %v2030_v62 = vpop.f32.mrb[15].mxu0  ;;  %2180 = vst.msk [vmem:[%s3603_s4 + $0x58] sm:$0xff] %vm2168_vm2, %v2147_v60  ;;  %v2894_v18 = vadd.f32 %v2893_v59, %v2793_v42 }
 0x18f   : > { %2179 = vst.msk [vmem:[%s3603_s4 + $0x50] sm:$0xff] %vm2168_vm2, %v2146_v19  ;;  %v2896_v23 = vadd.f32 %v2895_v49, %v2018_v50  ;;  %v2628_v55 = vpop.f32.mrb[14].mxu1 }
 0x190   : > { %v2149_v21 = vmax.f32 %v2894_v18, 0.0  ;;  %v2897_v15 = vadd.f32 %v2628_v55, %v3594_v1  ;;  %v1158_v58 = vpop.f32.mrb[15].mxu1 }
 0x191   : > { %v2799_v20 = vpop.f32.mrb[16].mxu0  ;;  %v2148_v32 = vmax.f32 %v2896_v23, 0.0  ;;  %v2899_v56 = vadd.f32 %v3594_v1, %v1158_v58 }
 0x192   : > { %v2042_v17 = vpop.f32.mrb[17].mxu0  ;;  %2182 = vst.msk [vmem:[%s3603_s4 + $0x68] sm:$0xff] %vm2168_vm2, %v2149_v21  ;;  %v2898_v6 = vadd.f32 %v2897_v15, %v2796_v47 }
 0x193   : > { %2181 = vst.msk [vmem:[%s3603_s4 + $0x60] sm:$0xff] %vm2168_vm2, %v2148_v32  ;;  %v2900_v27 = vadd.f32 %v2899_v56, %v2030_v62  ;;  %v2631_v22 = vpop.f32.mrb[16].mxu1 }
 0x194   : > { %v2151_v61 = vmax.f32 %v2898_v6, 0.0  ;;  %v2901_v34 = vadd.f32 %v2631_v22, %v3594_v1  ;;  %v1172_v2 = vpop.f32.mrb[17].mxu1 }
 0x195   : > { %v2802_v3 = vpop.f32.mrb[18].mxu0  ;;  %v2150_v37 = vmax.f32 %v2900_v27, 0.0  ;;  %v2903_v57 = vadd.f32 %v3594_v1, %v1172_v2 }
 0x196   : > { %v2054_v9 = vpop.f32.mrb[19].mxu0  ;;  %2184 = vst.msk [vmem:[%s3603_s4 + $0x78] sm:$0xff] %vm2168_vm2, %v2151_v61  ;;  %v2902_v10 = vadd.f32 %v2901_v34, %v2799_v20 }
 0x197   : > { %2183 = vst.msk [vmem:[%s3603_s4 + $0x70] sm:$0xff] %vm2168_vm2, %v2150_v37  ;;  %v2904_v16 = vadd.f32 %v2903_v57, %v2042_v17  ;;  %v2634_v28 = vpop.f32.mrb[18].mxu1 }
 0x198   : > { %v2153_v53 = vmax.f32 %v2902_v10, 0.0  ;;  %v2905_v4 = vadd.f32 %v2634_v28, %v3594_v1  ;;  %v1186_v14 = vpop.f32.mrb[19].mxu1 }
 0x199   : > { %v2805_v41 = vpop.f32.mrb[20].mxu0  ;;  %v2152_v48 = vmax.f32 %v2904_v16, 0.0  ;;  %v2907_v25 = vadd.f32 %v3594_v1, %v1186_v14 }
 0x19a   : > { %v2066_v36 = vpop.f32.mrb[21].mxu0  ;;  %2186 = vst.msk [vmem:[%s3603_s4 + $0x88] sm:$0xff] %vm2168_vm2, %v2153_v53  ;;  %v2906_v5 = vadd.f32 %v2905_v4, %v2802_v3 }
 0x19b   : > { %2185 = vst.msk [vmem:[%s3603_s4 + $0x80] sm:$0xff] %vm2168_vm2, %v2152_v48  ;;  %v2908_v52 = vadd.f32 %v2907_v25, %v2054_v9  ;;  %v2637_v54 = vpop.f32.mrb[20].mxu1 }
 0x19c   : > { %v2155_v24 = vmax.f32 %v2906_v5, 0.0  ;;  %v2909_v11 = vadd.f32 %v2637_v54, %v3594_v1  ;;  %v1200_v38 = vpop.f32.mrb[21].mxu1 }
 0x19d   : > { %v2808_v7 = vpop.f32.mrb[22].mxu0  ;;  %v2154_v12 = vmax.f32 %v2908_v52, 0.0  ;;  %v2911_v13 = vadd.f32 %v3594_v1, %v1200_v38 }
 0x19e   : > { %v2078_v8 = vpop.f32.mrb[23].mxu0  ;;  %2188 = vst.msk [vmem:[%s3603_s4 + $0x98] sm:$0xff] %vm2168_vm2, %v2155_v24  ;;  %v2910_v29 = vadd.f32 %v2909_v11, %v2805_v41 }
 0x19f   : > { %2187 = vst.msk [vmem:[%s3603_s4 + $0x90] sm:$0xff] %vm2168_vm2, %v2154_v12  ;;  %v2912_v30 = vadd.f32 %v2911_v13, %v2066_v36  ;;  %v2640_v31 = vpop.f32.mrb[22].mxu1 }
 0x1a0   : > { %v2157_v39 = vmax.f32 %v2910_v29, 0.0  ;;  %v2913_v40 = vadd.f32 %v2640_v31, %v3594_v1  ;;  %v1214_v42 = vpop.f32.mrb[23].mxu1 }
 0x1a1   : > { %v2811_v35 = vpop.f32.mrb[24].mxu0  ;;  %v2156_v45 = vmax.f32 %v2912_v30, 0.0  ;;  %v2915_v46 = vadd.f32 %v3594_v1, %v1214_v42 }
 0x1a2   : > { %v2090_v44 = vpop.f32.mrb[25].mxu0  ;;  %2190 = vst.msk [vmem:[%s3603_s4 + $0xa8] sm:$0xff] %vm2168_vm2, %v2157_v39  ;;  %v2914_v50 = vadd.f32 %v2913_v40, %v2808_v7 }
 0x1a3   : > { %2189 = vst.msk [vmem:[%s3603_s4 + $0xa0] sm:$0xff] %vm2168_vm2, %v2156_v45  ;;  %v2916_v51 = vadd.f32 %v2915_v46, %v2078_v8  ;;  %v2643_v63 = vpop.f32.mrb[24].mxu1 }
 0x1a4   : > { %v2159_v33 = vmax.f32 %v2914_v50, 0.0  ;;  %v2917_v43 = vadd.f32 %v2643_v63, %v3594_v1  ;;  %v1228_v47 = vpop.f32.mrb[25].mxu1 }
 0x1a5   : > { %v2814_v26 = vpop.f32.mrb[26].mxu0  ;;  %v2158_v59 = vmax.f32 %v2916_v51, 0.0  ;;  %v2919_v0 = vadd.f32 %v3594_v1, %v1228_v47 }
 0x1a6   : > { %v2102_v60 = vpop.f32.mrb[27].mxu0  ;;  %2192 = vst.msk [vmem:[%s3603_s4 + $0xb8] sm:$0xff] %vm2168_vm2, %v2159_v33  ;;  %v2918_v62 = vadd.f32 %v2917_v43, %v2811_v35 }
 0x1a7   : > { %2191 = vst.msk [vmem:[%s3603_s4 + $0xb0] sm:$0xff] %vm2168_vm2, %v2158_v59  ;;  %v2920_v19 = vadd.f32 %v2919_v0, %v2090_v44  ;;  %v2646_v49 = vpop.f32.mrb[26].mxu1 }
 0x1a8   : > { %v2161_v23 = vmax.f32 %v2918_v62, 0.0  ;;  %v2921_v55 = vadd.f32 %v2646_v49, %v3594_v1  ;;  %v1242_v20 = vpop.f32.mrb[27].mxu1 }
 0x1a9   : > { %v2817_v18 = vpop.f32.mrb[28].mxu0  ;;  %v2160_v15 = vmax.f32 %v2920_v19, 0.0  ;;  %v2923_v58 = vadd.f32 %v3594_v1, %v1242_v20 }
 0x1aa   : > { %v2114_v21 = vpop.f32.mrb[29].mxu0  ;;  %2194 = vst.msk [vmem:[%s3603_s4 + $0xc8] sm:$0xff] %vm2168_vm2, %v2161_v23  ;;  %v2922_v17 = vadd.f32 %v2921_v55, %v2814_v26 }
 0x1ab   : > { %2193 = vst.msk [vmem:[%s3603_s4 + $0xc0] sm:$0xff] %vm2168_vm2, %v2160_v15  ;;  %v2924_v32 = vadd.f32 %v2923_v58, %v2102_v60  ;;  %v2649_v56 = vpop.f32.mrb[28].mxu1 }
 0x1ac   : > { %v2163_v27 = vmax.f32 %v2922_v17, 0.0  ;;  %v2925_v22 = vadd.f32 %v2649_v56, %v3594_v1  ;;  %v1256_v3 = vpop.f32.mrb[29].mxu1 }
 0x1ad   : > { %v2820_v6 = vpop.f32.mrb[30].mxu0  ;;  %v2162_v34 = vmax.f32 %v2924_v32, 0.0  ;;  %v2927_v2 = vadd.f32 %v3594_v1, %v1256_v3 }
 0x1ae   : > { %v2126_v61 = vpop.f32.mrb[31].mxu0  ;;  %2196 = vst.msk [vmem:[%s3603_s4 + $0xd8] sm:$0xff] %vm2168_vm2, %v2163_v27  ;;  %v2926_v9 = vadd.f32 %v2925_v22, %v2817_v18 }
 0x1af   : > { %2195 = vst.msk [vmem:[%s3603_s4 + $0xd0] sm:$0xff] %vm2168_vm2, %v2162_v34  ;;  %v2928_v37 = vadd.f32 %v2927_v2, %v2114_v21  ;;  %v2652_v57 = vpop.f32.mrb[30].mxu1 }
 0x1b0   : > { %v2165_v10 = vmax.f32 %v2926_v9, 0.0  ;;  %v2929_v16 = vadd.f32 %v2652_v57, %v3594_v1  ;;  %v1270_v28 = vpop.f32.mrb[31].mxu1 }
 0x1b1   : > { %v2164_v41 = vmax.f32 %v2928_v37, 0.0  ;;  %v2931_v53 = vadd.f32 %v3594_v1, %v1270_v28 }
 0x1b2   : > { %2198 = vst.msk [vmem:[%s3603_s4 + $0xe8] sm:$0xff] %vm2168_vm2, %v2165_v10  ;;  %v2930_v4 = vadd.f32 %v2929_v16, %v2820_v6 }
 0x1b3   : > { %2197 = vst.msk [vmem:[%s3603_s4 + $0xe0] sm:$0xff] %vm2168_vm2, %v2164_v41  ;;  %v2932_v14 = vadd.f32 %v2931_v53, %v2126_v61 }
 0x1b4   : > { %v2167_v36 = vmax.f32 %v2930_v4, 0.0 }
 0x1b5   : > { %v2166_v48 = vmax.f32 %v2932_v14, 0.0 }
 0x1b6   : > { %2200 = vst.msk [vmem:[%s3603_s4 + $0xf8] sm:$0xff] %vm2168_vm2, %v2167_v36 }
 0x1b7   : > { %2199 = vst.msk [vmem:[%s3603_s4 + $0xf0] sm:$0xff] %vm2168_vm2, %v2166_v48 }
 0x1b8 PF: > { %s13_s12 = sadd.s32 1, %s3075_s12  }
 0x1b9   : > { %p10_p4 = scmp.ge.s32.totalorder %s13_s12, 10  }
 0x1bb   :  { %12 = sbr.rel (!%p10_p4) target bundleno = 1 (0x1), region = 62 }

</bundles_post_ra>
